<compile_context>
chip_gen: v6e
topology: v6e:2x2x1
jax: 0.10.0
libtpu: 0.0.40
codegen_flags: <defaults>
</compile_context>

<pallas_src>
import functools

import jax
import jax.numpy as jnp
from jax import lax
from jax.experimental import pallas as pl
from jax.experimental.pallas import tpu as pltpu


# Generous on v5e/v6e (128 MiB physical; defaults are 16/32 MiB).  On v7x
# (64 MiB physical) shrink tiles / lower this if targeting long sequences.
_VMEM_LIMIT = 64 * 1024 * 1024


# ----------------------------------------------------------------------------
# Linear (GEMM + bias) kernel, used for the fused QKV and output projections.
# ----------------------------------------------------------------------------
def _linear_kernel(x_ref, w_ref, b_ref, o_ref):
    """o = x @ w + b.  x:(tm,K) bf16, w:(K,N) bf16, b:(1,N) f32, o:(tm,N)."""
    acc = jnp.dot(x_ref[...], w_ref[...], preferred_element_type=jnp.float32)
    o_ref[...] = (acc + b_ref[...]).astype(o_ref.dtype)


def _linear(x2d, w, b, out_dtype):
    M, K = x2d.shape
    N = w.shape[1]
    tm = M
    for cand in (512, 256, 128):
        if M % cand == 0:
            tm = cand
            break
    return pl.pallas_call(
        _linear_kernel,
        out_shape=jax.ShapeDtypeStruct((M, N), out_dtype),
        grid_spec=pltpu.PrefetchScalarGridSpec(
            num_scalar_prefetch=0,
            grid=(M // tm,),
            in_specs=[
                pl.BlockSpec((tm, K), lambda i: (i, 0)),
                pl.BlockSpec((K, N), lambda i: (0, 0)),   # grid-invariant weight
                pl.BlockSpec((1, N), lambda i: (0, 0)),   # grid-invariant bias
            ],
            out_specs=pl.BlockSpec((tm, N), lambda i: (i, 0)),
        ),
        compiler_params=pltpu.CompilerParams(
            dimension_semantics=("parallel",),
            vmem_limit_bytes=_VMEM_LIMIT),
    )(x2d, w, b)


# ----------------------------------------------------------------------------
# Flash-style causal attention kernel (online softmax over KV tiles).
# ----------------------------------------------------------------------------
def _flash_attn_kernel(q_ref, k_ref, v_ref, o_ref, m_sc, l_sc, acc_sc, *,
                       tq, tk, scale):
    qi = pl.program_id(2)
    ki = pl.program_id(3)
    n_kv = pl.num_programs(3)
    q_start = qi * tq
    k_start = ki * tk

    @pl.when(ki == 0)
    def _init():
        m_sc[...] = jnp.full_like(m_sc, -jnp.inf)
        l_sc[...] = jnp.zeros_like(l_sc)
        acc_sc[...] = jnp.zeros_like(acc_sc)

    # Skip KV tiles that lie entirely above the causal diagonal (~2x flops).
    @pl.when(k_start <= q_start + (tq - 1))
    def _update():
        q = q_ref[...]                       # (tq, hd) bf16
        k = k_ref[...]                       # (tk, hd) bf16
        v = v_ref[...]                       # (tk, hd) bf16

        # q @ k^T as an NT dot_general (no explicit XLU transpose of k).
        s = lax.dot_general(q, k, (((1,), (1,)), ((), ())),
                            preferred_element_type=jnp.float32)      # (tq, tk)

        # Additive causal mask in f32 (0 where key <= query, -inf above diag);
        # score scaling applied in f32, matching the reference rounding path.
        q_pos = q_start + lax.broadcasted_iota(jnp.int32, (tq, tk), 0)
        k_pos = k_start + lax.broadcasted_iota(jnp.int32, (tq, tk), 1)
        mask_add = jnp.where(q_pos >= k_pos, 0.0, -jnp.inf).astype(jnp.float32)
        s = s * scale + mask_add

        m_prev = m_sc[...]
        m_new = jnp.maximum(m_prev, jnp.max(s, axis=-1, keepdims=True))
        alpha = jnp.exp(m_prev - m_new)
        p = jnp.exp(s - m_new)
        l_sc[...] = alpha * l_sc[...] + jnp.sum(p, axis=-1, keepdims=True)
        acc_sc[...] = alpha * acc_sc[...] + jnp.dot(
            p.astype(jnp.bfloat16), v, preferred_element_type=jnp.float32)
        m_sc[...] = m_new

    @pl.when(ki == n_kv - 1)
    def _finalize():
        # TODO(synk): attention-weight dropout omitted (inference / p == 0 path).
        inv_l = pl.reciprocal(l_sc[...], approx=True)
        o_ref[...] = (acc_sc[...] * inv_l).astype(o_ref.dtype)


def _flash_attention(q, k, v, *, scale, q_tile=128, kv_tile=128):
    """q/k/v: (B, H, T, hd) bf16 -> per-head context (B, H, T, hd) bf16."""
    B, H, T, hd = q.shape
    tq = q_tile if T % q_tile == 0 else T
    tk = kv_tile if T % kv_tile == 0 else T
    n_q, n_kv = T // tq, T // tk

    kernel = functools.partial(_flash_attn_kernel, tq=tq, tk=tk, scale=scale)

    def q_map(b, h, qi, ki):
        return (b, h, qi, 0)

    def kv_map(b, h, qi, ki):
        # Clamp at the diagonal tile: fully-masked KV tiles keep the previous
        # block index, so Pallas elides their (unused) DMA fetch.
        ki_max = (qi * tq + tq - 1) // tk
        return (b, h, jnp.minimum(ki, ki_max), 0)

    return pl.pallas_call(
        kernel,
        out_shape=jax.ShapeDtypeStruct((B, H, T, hd), jnp.bfloat16),
        grid_spec=pltpu.PrefetchScalarGridSpec(
            num_scalar_prefetch=0,
            grid=(B, H, n_q, n_kv),
            in_specs=[
                pl.BlockSpec((None, None, tq, hd), q_map),
                pl.BlockSpec((None, None, tk, hd), kv_map),
                pl.BlockSpec((None, None, tk, hd), kv_map),
            ],
            out_specs=pl.BlockSpec((None, None, tq, hd), q_map),
            scratch_shapes=[
                pltpu.VMEM((tq, 1), jnp.float32),    # running row max
                pltpu.VMEM((tq, 1), jnp.float32),    # running denominator
                pltpu.VMEM((tq, hd), jnp.float32),   # running output accumulator
            ],
        ),
        compiler_params=pltpu.CompilerParams(
            # B and H stay parallel (megacore-shardable on v7x); only the KV
            # reduction axis is arbitrary.
            dimension_semantics=("parallel", "parallel", "parallel", "arbitrary"),
            vmem_limit_bytes=_VMEM_LIMIT),
    )(q, k, v)


# ----------------------------------------------------------------------------
# Full module forward.
# ----------------------------------------------------------------------------
def multi_head_attention(x, wq, wk, wv, wo, bo, *, num_heads,
                         q_tile=128, kv_tile=128):
    """x: (B,T,D_in); wq/wk/wv: (D_in,D_out); wo: (D_out,D_out); bo: (D_out,)."""
    B, T, D_in = x.shape
    D_out = wq.shape[1]
    assert D_out % num_heads == 0
    hd = D_out // num_heads
    out_dtype = x.dtype
    scale = float(1.0 / (hd ** 0.5))

    # --- 1. Fused QKV projection: one GEMM, K/V computed exactly once. ------
    w_qkv = jnp.concatenate([wq, wk, wv], axis=1).astype(jnp.bfloat16)
    zero_bias = jnp.zeros((1, 3 * D_out), jnp.float32)   # qkv_bias=False
    x2d = x.reshape(B * T, D_in).astype(jnp.bfloat16)
    qkv = _linear(x2d, w_qkv, zero_bias, jnp.bfloat16)   # (B*T, 3*D_out) bf16

    # Layout plumbing (XLA-side): (B, H, T, hd) per-head lane-dense blocks.
    qkv = qkv.reshape(B, T, 3, num_heads, hd)
    q = qkv[:, :, 0].transpose(0, 2, 1, 3)
    k = qkv[:, :, 1].transpose(0, 2, 1, 3)
    v = qkv[:, :, 2].transpose(0, 2, 1, 3)

    # --- 2. Flash-style causal attention. -----------------------------------
    ctx = _flash_attention(q, k, v, scale=scale, q_tile=q_tile, kv_tile=kv_tile)

    # --- 3. Output projection: single K = D_out GEMM + bias. ----------------
    ctx2d = ctx.transpose(0, 2, 1, 3).reshape(B * T, D_out)
    out = _linear(ctx2d, wo.astype(jnp.bfloat16),
                  bo.reshape(1, D_out).astype(jnp.float32), out_dtype)
    return out.reshape(B, T, D_out)


# ----------------------------------------------------------------------------
# Pure-JAX reference (mirrors the PyTorch module).
# ----------------------------------------------------------------------------
def _reference(x, wq, wk, wv, wo, bo, *, num_heads):
    B, T, D_in = x.shape
    D_out = wq.shape[1]
    hd = D_out // num_heads
    q = (x @ wq).reshape(B, T, num_heads, hd).transpose(0, 2, 1, 3)
    k = (x @ wk).reshape(B, T, num_heads, hd).transpose(0, 2, 1, 3)
    v = (x @ wv).reshape(B, T, num_heads, hd).transpose(0, 2, 1, 3)
    scores = jnp.einsum("bhqd,bhkd->bhqk", q, k)
    mask = jnp.triu(jnp.ones((T, T), bool), k=1)
    scores = jnp.where(mask, -jnp.inf, scores) / (hd ** 0.5)
    attn = jax.nn.softmax(scores, axis=-1)
    ctx = jnp.einsum("bhqk,bhkd->bhqd", attn, v).transpose(0, 2, 1, 3)
    return ctx.reshape(B, T, D_out) @ wo + bo


if __name__ == "__main__":
    # Small shapes consistent with the module's forward.
    B, T = 2, 8
    D_in, D_out = 32, 32
    num_heads = 4

    key = jax.random.PRNGKey(0)
    kx, kq, kk, kv, ko, kb = jax.random.split(key, 6)

    x = jax.random.normal(kx, (B, T, D_in), dtype=jnp.float32)
    # Deterministic synthetic parameters (qkv_bias=False; out projection has bias).
    wq = jax.random.normal(kq, (D_in, D_out), dtype=jnp.float32) * 0.05
    wk = jax.random.normal(kk, (D_in, D_out), dtype=jnp.float32) * 0.05
    wv = jax.random.normal(kv, (D_in, D_out), dtype=jnp.float32) * 0.05
    wo = jax.random.normal(ko, (D_out, D_out), dtype=jnp.float32) * 0.05
    bo = jax.random.normal(kb, (D_out,), dtype=jnp.float32) * 0.05

    out = multi_head_attention(x, wq, wk, wv, wo, bo, num_heads=num_heads)
    out = jax.block_until_ready(out)
    assert out.shape == (B, T, D_out)

    # Reference on bf16-rounded inputs (kernel feeds bf16 operands to the MXU).
    def _rnd(a):
        return a.astype(jnp.bfloat16).astype(jnp.float32)

    ref = _reference(_rnd(x), _rnd(wq), _rnd(wk), _rnd(wv), _rnd(wo), bo,
                     num_heads=num_heads)
    max_err = float(jnp.max(jnp.abs(out.astype(jnp.float32) - ref)))
    assert jnp.allclose(out.astype(jnp.float32), ref, atol=2e-2, rtol=2e-2), max_err

    print("KERNEL_OK")
</pallas_src>

<mosaic_0001>
module attributes {stable_mosaic.version = 11 : i64} {
  func.func @_linear_kernel(%arg0: i32, %arg1: memref<16x32xbf16, #tpu.memory_space<vmem>>, %arg2: memref<32x96xbf16, #tpu.memory_space<vmem>>, %arg3: memref<1x96xf32, #tpu.memory_space<vmem>>, %arg4: memref<16x96xbf16, #tpu.memory_space<vmem>>) attributes {dimension_semantics = [#tpu.dimension_semantics<parallel>], iteration_bounds = array<i64: 1>, scalar_prefetch = 0 : i64, scratch_operands = 0 : i64, tpu.core_type = #tpu.core_type<tc>, window_params = [{transform_indices = @transform_0, window_bounds = array<i64: 16, 32>}, {pipeline_mode = #tpu.pipeline_mode<synchronous>, transform_indices = @transform_1, window_bounds = array<i64: 32, 96>}, {pipeline_mode = #tpu.pipeline_mode<synchronous>, transform_indices = @transform_2, window_bounds = array<i64: 1, 96>}, {transform_indices = @transform_3, window_bounds = array<i64: 16, 96>}]} {
    %c0 = arith.constant 0 : index
    %c0_0 = arith.constant 0 : index
    %0 = vector.load %arg1[%c0, %c0_0] : memref<16x32xbf16, #tpu.memory_space<vmem>>, vector<16x32xbf16>
    %c0_1 = arith.constant 0 : index
    %c0_2 = arith.constant 0 : index
    %1 = vector.load %arg2[%c0_1, %c0_2] : memref<32x96xbf16, #tpu.memory_space<vmem>>, vector<32x96xbf16>
    %cst = arith.constant dense<0.000000e+00> : vector<16x96xf32>
    %2 = tpu.matmul %0, %1, %cst {dimension_numbers = #tpu.dot_dimension_numbers<[1], [0], [0], [1], [0, 0, 1, 1], [], []>} : vector<16x32xbf16>, vector<32x96xbf16>, vector<16x96xf32> -> vector<16x96xf32>
    %c0_3 = arith.constant 0 : index
    %c0_4 = arith.constant 0 : index
    %3 = vector.load %arg3[%c0_3, %c0_4] : memref<1x96xf32, #tpu.memory_space<vmem>>, vector<1x96xf32>
    %4 = vector.broadcast %3 : vector<1x96xf32> to vector<16x96xf32>
    %5 = arith.addf %2, %4 : vector<16x96xf32>
    %6 = arith.truncf %5 : vector<16x96xf32> to vector<16x96xbf16>
    %c0_5 = arith.constant 0 : index
    %c0_6 = arith.constant 0 : index
    %7 = vector.load %arg4[%c0_5, %c0_6] : memref<16x96xbf16, #tpu.memory_space<vmem>>, vector<16x96xbf16>
    tpu.vector_store %arg4[%c0_5, %c0_6], %6 {strides = array<i32>} : memref<16x96xbf16, #tpu.memory_space<vmem>>, vector<16x96xbf16>,
    return
  }
  func.func @transform_0(%arg0: i32) -> (i32, i32) {
    %c0_i32 = arith.constant 0 : i32
    %c0_i32_0 = arith.constant 0 : i32
    return %arg0, %c0_i32 : i32, i32
  }
  func.func @transform_1(%arg0: i32) -> (i32, i32) {
    %c0_i32 = arith.constant 0 : i32
    %c0_i32_0 = arith.constant 0 : i32
    %c0_i32_1 = arith.constant 0 : i32
    return %c0_i32, %c0_i32_0 : i32, i32
  }
  func.func @transform_2(%arg0: i32) -> (i32, i32) {
    %c0_i32 = arith.constant 0 : i32
    %c0_i32_0 = arith.constant 0 : i32
    %c0_i32_1 = arith.constant 0 : i32
    return %c0_i32, %c0_i32_0 : i32, i32
  }
  func.func @transform_3(%arg0: i32) -> (i32, i32) {
    %c0_i32 = arith.constant 0 : i32
    %c0_i32_0 = arith.constant 0 : i32
    return %arg0, %c0_i32 : i32, i32
  }
}

</mosaic_0001>

<bundles_post_ra>
// kernel: tpu_custom_call.1
= control target key start
LH: loop header
LB: loop body
LE: loop exit
PB: predicated region body
PF: predicated region fallthrough
CT: control target
= control target key end

     0   :  { %8 = vsyncpa [#allocation3], 0  ;;  %s292_s0 = inlined_call_operand.hbm [shape: bf16[16,32], index: 0, kind: input, shape index: {}]   ;;  %s293_s1 = inlined_call_operand.hbm [shape: bf16[32,96], index: 1, kind: input, shape index: {}]   ;;  %s294_s2 = inlined_call_operand.vmem [shape: f32[1,96], index: 2, kind: input, shape index: {}]   ;;  %s295_s3 = inlined_call_operand.hbm [shape: bf16[16,96], index: 3, kind: output, shape index: {}]  }
   0x1   :  { %9 = vsyncpa [#allocation6], 0 }
   0x2   :  { %10 = vsyncpa [#allocation4], 0  ;;  %s244_s12 = smov [#allocation2]  }
   0x3   :  { %s16_s13 = sshll.u32 %s244_s12, 4  ;;  %s17_s13 = int_to_ptr.vmem [resolvable:$true] %s16_s13 }
   0x4   :  { %s186_s14 = scalar_lea.vmem %s17_s13, 128  ;;  %p191_p1 = scmp.lt.s32.totalorder %s17_s13, %s17_s13 }
   0x5   :  { %p187_p0 = scmp.ne.s32.totalorder %s17_s13, %s186_s14  ;;  %p192_p2 = scmp.lt.s32.totalorder %s186_s14, %s186_s14 }
   0x7   :  { %p193_p3 = por %p192_p2, %p191_p1 }
   0x9   :  { %p194_p4 = pnand %p193_p3, %p187_p0 }
   0xb   :  { %197 = shalt.err (!%p194_p4)
}
   0xc   :  { %s245_s15 = smov 64   ;;  %s246_s16 = smov 4  }
   0xd   :  { %22 = dma.hbm_to_vmem [thread:$0]  %s292_s0, 128, %s17_s13, [#allocation3], %s245_s15, %s245_s15, %s246_s16  }
   0xe   :  { %s247_s19 = smov [#allocation5]  }
   0xf   :  { %s28_s20 = sshll.u32 %s247_s19, 4  ;;  %s29_s20 = int_to_ptr.vmem [resolvable:$true] %s28_s20 }
  0x10   :  { %s206_s21 = scalar_lea.vmem %s29_s20, 256  ;;  %p211_p6 = scmp.lt.s32.totalorder %s29_s20, %s29_s20 }
  0x11   :  { %p207_p5 = scmp.ne.s32.totalorder %s29_s20, %s206_s21  ;;  %p212_p7 = scmp.lt.s32.totalorder %s206_s21, %s206_s21 }
  0x13   :  { %p213_p8 = por %p212_p7, %p211_p6 }
  0x15   :  { %p214_p9 = pnand %p213_p8, %p207_p5 }
  0x17   :  { %217 = shalt.err (!%p214_p9)
}
  0x18   :  { %34 = dma.hbm_to_vmem [thread:$0]  %s293_s1, 256, %s29_s20, [#allocation6], %s245_s15, %s245_s15, %s246_s16  }
  0x19   :  { %238 = dma.done.wait [#allocation3], 128  }
  0x1a   :  { %239 = vsyncadd [#allocation3], 4294967168 }
  0x1b   :  { %240 = dma.done.wait [#allocation6], 256  }
  0x1c   :  { %241 = vsyncadd [#allocation6], 4294967040  ;;  %v248_v0 = vmov 0.0   ;;  %vm249_vm0 = vmmov 0   ;;  %v175_v1 = vld [vmem:[#allocation5 + $0x8] sm:$0xff]   ;;  %v176_v2 = vld [vmem:[#allocation5] sm:$0xff]  }
  0x1d   :  { %160 = vmatprep.subr.bf16.mxu0 %v248_v0  ;;  %164 = vmatprep.mubr.msk.bf16.mxu0 %vm249_vm0, %v248_v0  ;;  %v177_v3 = vld [vmem:[#allocation2] sm:$0xff]   ;;  %vm74_vm1 = vcmask 261120   ;;  %vm127_vm2 = vcmask 781312   ;;  %s250_s1 = smov [#allocation7]  }
  0x1e   :  { %161 = vmatpush3.bf16.msra.mxu0 %v175_v1  ;;  %v148_v4 = vld [vmem:[%s294_s2] ss:$0 sm:$0xff]  ;;  %s135_s25 = sshll.u32 %s250_s1, 4  ;;  %s136_s25 = int_to_ptr.vmem [resolvable:$true] %s135_s25 }
  0x1f   :  { %162 = vmatprep.subr.bf16.mxu0 %v248_v0  ;;  %s218_s26 = scalar_lea.vmem %s136_s25, 128  ;;  %p223_p11 = scmp.lt.s32.totalorder %s136_s25, %s136_s25 }
  0x20   :  { %p219_p10 = scmp.ne.s32.totalorder %s136_s25, %s218_s26  ;;  %p224_p12 = scmp.lt.s32.totalorder %s218_s26, %s218_s26 }
  0x22   :  { %163 = vmatpush3.bf16.msra.mxu0 %v176_v2  ;;  %p225_p13 = por %p224_p12, %p223_p11 }
  0x24   :  { %p226_p0 = pnand %p225_p13, %p219_p10 }
  0x25   :  { %165 = vmatmul.mubr.msk.bf16.vlgmr.msra.gmra.mxu0 %vm74_vm1, %v177_v3 }
  0xe5   :  { %v112_v5 = vpop.f32.mrf.mxu0 }
  0xe6   :  { %v113_v6 = vadd.f32 %v148_v4, %v112_v5 }
  0xe7   :  { %v166_v7 = vpop.f32.mrf.mxu0 }
  0xe8   :  { %v155_v8 = vpack.c.bf16 %v113_v6, %v113_v6 }
  0xe9   :  { %v115_v9 = vpop.f32.mrf.mxu0 }
  0xea   :  { %v116_v10 = vadd.f32 %v148_v4, %v115_v9  ;;  %128 = vst.msk [vmem:[#allocation7] sm:$0xf] %vm127_vm2, %v155_v8 }
  0xeb   :  { %v167_v11 = vpop.f32.mrf.mxu0 }
  0xec   :  { %v156_v12 = vpack.c.bf16 %v116_v10, %v116_v10 }
  0xee   :  { %129 = vst.msk [vmem:[#allocation7 + $0x4] sm:$0xf] %vm127_vm2, %v156_v12 }
  0xef   :  { %229 = shalt.err (!%p226_p0)
}
  0xf0   :  { %141 = dma.vmem_to_hbm [thread:$0]  %s136_s25, 128, %s295_s3, [#allocation4], %s245_s15, %s245_s15, %s246_s16  }
  0xf1   :  { %242 = dma.done.wait [#allocation4], 128  }
  0xf2   :  { %243 = vsyncadd [#allocation4], 4294967168 }
  0xf3   :  { %145 = vsyncpa [#allocation3], 1 }
  0xf4   :  { %146 = vsyncpa [#allocation6], 1 }
  0xf5   :  { %147 = vsyncpa [#allocation4], 1 }

</bundles_post_ra>
